<compile_context>
chip_gen: v6e
topology: v6e:2x2x1
jax: 0.10.0
libtpu: 0.0.40
codegen_flags: <defaults>
</compile_context>

<pallas_src>
import jax
import jax.numpy as jnp
from jax.experimental import pallas as pl
from jax.experimental.pallas import tpu as pltpu

HID = 24      # hidden width: 20 padded to a sublane multiple of 8
N_PAD = 128   # lane-dense fused batch width (one vreg of lanes)


def _mfnn_kernel(scal_ref, nl_ref, x_ref, p_ref, out_ref):
    """Fused net_l + net_h_l forward over one lane-dense batch row.

    p_ref layout (5*HID, N_PAD), built once by prepare_params():
      rows [0:HID)        cols [0:HID) : w2.T zero-padded   (net_l layer_3 weight)
      rows [HID:2*HID)    all lanes    : w1 lane-broadcast  (net_l layer_1 weight)
      rows [2*HID:3*HID)  all lanes    : b1 lane-broadcast
      rows [3*HID:4*HID)  all lanes    : b2 lane-broadcast
      rows [4*HID:5*HID)  all lanes    : w3 lane-broadcast  (net_l layer_5 weight)
    scal_ref (SMEM f32, 4): [b3, wh[0,0], wh[1,0], bh]
    nl_ref   (SMEM i32, 1): [n_l]  (runtime scalar -> no recompile per split)
    """
    x = x_ref[...]                                    # (1, N_PAD)

    w2t = p_ref[0 * HID:1 * HID, 0:HID]               # (HID, HID)
    w1b = p_ref[1 * HID:2 * HID, :]                   # (HID, N_PAD) full vregs
    b1b = p_ref[2 * HID:3 * HID, :]
    b2b = p_ref[3 * HID:4 * HID, :]
    w3b = p_ref[4 * HID:5 * HID, :]

    # ---- net_l evaluated once over the fused batch [x_l | x_h | pad] ----
    # layer 1 (K=1): pure VPU FMA against pre-broadcast weight/bias rows.
    h = jnp.tanh(w1b * x + b1b)                       # (HID, N_PAD)
    # layer 2: the only real matmul (20x20 padded to 24x24) -> MXU, exact f32.
    h = jnp.tanh(
        jnp.dot(w2t, h, preferred_element_type=jnp.float32,
                precision=jax.lax.Precision.HIGHEST) + b2b)
    # layer 3 (out=1): VPU multiply + XLU sublane reduction (no M=1 MXU pass).
    y = jnp.sum(w3b * h, axis=0, keepdims=True) + scal_ref[0]   # (1, N_PAD)

    # ---- fidelity correction net_h_l on the x_h lanes ----
    # y_h = y_l_h*wh[0,0] + x_h*wh[1,0] + bh  (== cat([y_l_h, x_h]) @ wh + bh)
    lane = jax.lax.broadcasted_iota(jnp.int32, y.shape, dimension=1)
    y_corr = y * scal_ref[1] + x * scal_ref[2] + scal_ref[3]
    out_ref[...] = jnp.where(lane < nl_ref[0], y, y_corr)


def prepare_params(params, n_pad=N_PAD):
    """One-time parameter packing (hoisted off the per-call hot path).

    Returns:
      slab: (5*HID, n_pad) f32 — one contiguous, tile-aligned VMEM DMA.
      scal: (4,) f32 — [b3, wh[0,0], wh[1,0], bh] for SMEM.
    """
    (w1, b1, w2, b2, w3, b3, wh, bh) = params
    f32 = jnp.float32

    def col(v):  # flatten, zero-pad 20 -> HID, return (HID, 1) column
        v = jnp.asarray(v, f32).reshape(-1)
        return jnp.pad(v, (0, HID - v.shape[0]))[:, None]

    w2t = jnp.zeros((HID, n_pad), f32).at[:20, :20].set(jnp.asarray(w2, f32).T)
    w1b = jnp.broadcast_to(col(w1), (HID, n_pad))
    b1b = jnp.broadcast_to(col(b1), (HID, n_pad))
    b2b = jnp.broadcast_to(col(b2), (HID, n_pad))
    w3b = jnp.broadcast_to(col(w3), (HID, n_pad))
    slab = jnp.concatenate([w2t, w1b, b1b, b2b, w3b], axis=0)   # (120, n_pad)

    scal = jnp.stack([b3[0, 0], wh[0, 0], wh[1, 0], bh[0, 0]]).astype(f32)
    return jax.device_put(slab), jax.device_put(scal)


def _mfnn_pallas(scal, nl, x, slab):
    n_pad = x.shape[1]
    return pl.pallas_call(
        _mfnn_kernel,
        out_shape=jax.ShapeDtypeStruct((1, n_pad), jnp.float32),
        in_specs=[
            pl.BlockSpec(memory_space=pltpu.MemorySpace.SMEM),  # b3, wh00, wh10, bh
            pl.BlockSpec(memory_space=pltpu.MemorySpace.SMEM),  # n_l runtime scalar
            pl.BlockSpec(memory_space=pltpu.MemorySpace.VMEM),  # fused batch row
            pl.BlockSpec(memory_space=pltpu.MemorySpace.VMEM),  # packed param slab
        ],
        out_specs=pl.BlockSpec(memory_space=pltpu.MemorySpace.VMEM),
    )(scal, nl, x, slab)


@jax.jit
def mfnn_forward_fused(x_l, x_h, slab, scal):
    """Returns the fused lane-dense (1, n_pad) row: [y_l | y_h | zero pad]."""
    n_l, n_h = x_l.shape[0], x_h.shape[0]
    n = n_l + n_h
    n_pad = slab.shape[1]
    assert n <= n_pad, "TODO(synk): add a 1-D lane grid for batches > n_pad"
    x = jnp.concatenate([x_l[:, 0], x_h[:, 0]]).astype(jnp.float32)
    x = jnp.pad(x, (0, n_pad - n)).reshape(1, n_pad)
    nl = jnp.full((1,), n_l, jnp.int32)
    return _mfnn_pallas(scal, nl, x, slab)


@jax.jit
def mfnn_forward(x_l, x_h, slab, scal):
    """Matches Model.forward: returns (y_l (n_l,1), y_h (n_h,1))."""
    n_l, n_h = x_l.shape[0], x_h.shape[0]
    out = mfnn_forward_fused(x_l, x_h, slab, scal)
    y_l = out[0, :n_l].reshape(n_l, 1)
    y_h = out[0, n_l:n_l + n_h].reshape(n_h, 1)
    return y_l, y_h


def init_params(key):
    """Deterministic parameter init matching the PyTorch module's shapes.

    Weights are stored (in, out), i.e. transposed vs torch nn.Linear.weight,
    so y = x @ W + b.  Biases are (1, out) rows.
    """
    ks = jax.random.split(key, 8)
    # net_l: Linear(1,20) -> Tanh -> Linear(20,20) -> Tanh -> Linear(20,1)
    w1 = jax.random.normal(ks[0], (1, 20), jnp.float32) * 0.5
    b1 = jax.random.normal(ks[1], (1, 20), jnp.float32) * 0.1
    w2 = jax.random.normal(ks[2], (20, 20), jnp.float32) * 0.2
    b2 = jax.random.normal(ks[3], (1, 20), jnp.float32) * 0.1
    w3 = jax.random.normal(ks[4], (20, 1), jnp.float32) * 0.2
    b3 = jax.random.normal(ks[5], (1, 1), jnp.float32) * 0.1
    # net_h_l: Linear(2, 1)
    wh = jax.random.normal(ks[6], (2, 1), jnp.float32) * 0.5
    bh = jax.random.normal(ks[7], (1, 1), jnp.float32) * 0.1
    # TODO(synk): net_h_nl (Linear(2,10)->Tanh->...->Linear(10,1)) is defined
    # in the module's __init__ but never used in forward(); not instantiated.
    return (w1, b1, w2, b2, w3, b3, wh, bh)


def _reference(x_l, x_h, params):
    (w1, b1, w2, b2, w3, b3, wh, bh) = params

    def net_l(x):
        h = jnp.tanh(x @ w1 + b1)
        h = jnp.tanh(h @ w2 + b2)
        return h @ w3 + b3

    y_l = net_l(x_l)
    y_l_h = net_l(x_h)
    y_h = jnp.concatenate([y_l_h, x_h], axis=1) @ wh + bh
    return y_l, y_h


if __name__ == "__main__":
    key = jax.random.PRNGKey(0)
    k_p, k_l, k_h = jax.random.split(key, 3)

    params = init_params(k_p)
    slab, scal = prepare_params(params)           # one-time packing

    x_l = jax.random.normal(k_l, (16, 1), jnp.float32)  # low-fidelity inputs
    x_h = jax.random.normal(k_h, (8, 1), jnp.float32)   # high-fidelity inputs

    y_l, y_h = mfnn_forward(x_l, x_h, slab, scal)
    jax.block_until_ready((y_l, y_h))

    # Second call with a different split reuses the same compiled kernel
    # (n_l is a runtime SMEM scalar, only n_pad is baked in).
    y_l2, y_h2 = mfnn_forward(x_l[:10], x_h, slab, scal)
    jax.block_until_ready((y_l2, y_h2))

    y_l_ref, y_h_ref = _reference(x_l, x_h, params)
    y_l2_ref, y_h2_ref = _reference(x_l[:10], x_h, params)

    assert y_l.shape == (16, 1) and y_h.shape == (8, 1)
    assert jnp.allclose(y_l, y_l_ref, atol=1e-5, rtol=1e-5)
    assert jnp.allclose(y_h, y_h_ref, atol=1e-5, rtol=1e-5)
    assert jnp.allclose(y_l2, y_l2_ref, atol=1e-5, rtol=1e-5)
    assert jnp.allclose(y_h2, y_h2_ref, atol=1e-5, rtol=1e-5)

    print("KERNEL_OK")
</pallas_src>

<mosaic_0001>
module attributes {stable_mosaic.version = 11 : i64} {
  func.func @_mfnn_kernel(%arg0: memref<4xf32, #tpu.memory_space<smem>>, %arg1: memref<1xi32, #tpu.memory_space<smem>>, %arg2: memref<1x128xf32, #tpu.memory_space<vmem>>, %arg3: memref<120x128xf32, #tpu.memory_space<vmem>>, %arg4: memref<1x128xf32, #tpu.memory_space<vmem>>) attributes {dimension_semantics = [], scalar_prefetch = 0 : i64, scratch_operands = 0 : i64, tpu.core_type = #tpu.core_type<tc>} {
    %c0 = arith.constant 0 : index
    %c0_0 = arith.constant 0 : index
    %0 = vector.load %arg2[%c0, %c0_0] : memref<1x128xf32, #tpu.memory_space<vmem>>, vector<1x128xf32>
    %c0_1 = arith.constant 0 : index
    %c0_2 = arith.constant 0 : index
    %1 = vector.load %arg3[%c0_1, %c0_2] : memref<120x128xf32, #tpu.memory_space<vmem>>, vector<24x24xf32>
    %c24 = arith.constant 24 : index
    %c0_3 = arith.constant 0 : index
    %2 = vector.load %arg3[%c24, %c0_3] : memref<120x128xf32, #tpu.memory_space<vmem>>, vector<24x128xf32>
    %c48 = arith.constant 48 : index
    %c0_4 = arith.constant 0 : index
    %3 = vector.load %arg3[%c48, %c0_4] : memref<120x128xf32, #tpu.memory_space<vmem>>, vector<24x128xf32>
    %c72 = arith.constant 72 : index
    %c0_5 = arith.constant 0 : index
    %4 = vector.load %arg3[%c72, %c0_5] : memref<120x128xf32, #tpu.memory_space<vmem>>, vector<24x128xf32>
    %c96 = arith.constant 96 : index
    %c0_6 = arith.constant 0 : index
    %5 = vector.load %arg3[%c96, %c0_6] : memref<120x128xf32, #tpu.memory_space<vmem>>, vector<24x128xf32>
    %6 = vector.broadcast %0 : vector<1x128xf32> to vector<24x128xf32>
    %7 = arith.mulf %2, %6 : vector<24x128xf32>
    %8 = arith.addf %7, %3 : vector<24x128xf32>
    %9 = math.tanh %8 : vector<24x128xf32>
    %cst = arith.constant dense<0.000000e+00> : vector<24x128xf32>
    %10 = tpu.matmul %1, %9, %cst {dimension_numbers = #tpu.dot_dimension_numbers<[1], [0], [0], [1], [0, 0, 1, 1], [], []>, precision = #tpu.contract_precision<fp32>} : vector<24x24xf32>, vector<24x128xf32>, vector<24x128xf32> -> vector<24x128xf32>
    %11 = arith.addf %10, %4 : vector<24x128xf32>
    %12 = math.tanh %11 : vector<24x128xf32>
    %13 = arith.mulf %5, %12 : vector<24x128xf32>
    %cst_7 = arith.constant dense<0.000000e+00> : vector<128xf32>
    %14 = vector.multi_reduction <add>, %13, %cst_7 [0] : vector<24x128xf32> to vector<128xf32>
    %15 = vector.shape_cast %14 : vector<128xf32> to vector<1x128xf32>
    %c0_8 = arith.constant 0 : index
    %16 = memref.load %arg0[%c0_8] : memref<4xf32, #tpu.memory_space<smem>>
    %17 = vector.broadcast %16 : f32 to vector<1x128xf32>
    %18 = arith.addf %15, %17 : vector<1x128xf32>
    %19 = tpu.iota {dimensions = array<i32: 1>} : vector<1x128xi32>
    %c1 = arith.constant 1 : index
    %20 = memref.load %arg0[%c1] : memref<4xf32, #tpu.memory_space<smem>>
    %21 = vector.broadcast %20 : f32 to vector<1x128xf32>
    %22 = arith.mulf %18, %21 : vector<1x128xf32>
    %c2 = arith.constant 2 : index
    %23 = memref.load %arg0[%c2] : memref<4xf32, #tpu.memory_space<smem>>
    %24 = vector.broadcast %23 : f32 to vector<1x128xf32>
    %25 = arith.mulf %0, %24 : vector<1x128xf32>
    %26 = arith.addf %22, %25 : vector<1x128xf32>
    %c3 = arith.constant 3 : index
    %27 = memref.load %arg0[%c3] : memref<4xf32, #tpu.memory_space<smem>>
    %28 = vector.broadcast %27 : f32 to vector<1x128xf32>
    %29 = arith.addf %26, %28 : vector<1x128xf32>
    %c0_9 = arith.constant 0 : index
    %30 = memref.load %arg1[%c0_9] : memref<1xi32, #tpu.memory_space<smem>>
    %31 = vector.broadcast %30 : i32 to vector<1x128xi32>
    %32 = arith.cmpi slt, %19, %31 : vector<1x128xi32>
    %33 = arith.select %32, %18, %29 : vector<1x128xi1>, vector<1x128xf32>
    %c0_10 = arith.constant 0 : index
    %c0_11 = arith.constant 0 : index
    %34 = vector.load %arg4[%c0_10, %c0_11] : memref<1x128xf32, #tpu.memory_space<vmem>>, vector<1x128xf32>
    tpu.vector_store %arg4[%c0_10, %c0_11], %33 {strides = array<i32>} : memref<1x128xf32, #tpu.memory_space<vmem>>, vector<1x128xf32>,
    return
  }
}

</mosaic_0001>

<bundles_post_ra>
// kernel: mfnn_forward_fused.1
= control target key start
LH: loop header
LB: loop body
LE: loop exit
PB: predicated region body
PF: predicated region fallthrough
CT: control target
= control target key end

     0   :  { %10 = vsyncpa [#allocation6], 0  ;;  %s1074_s0 = inlined_call_operand.vmem [shape: f32[4], index: 0, kind: input, shape index: {}]   ;;  %s1075_s1 = inlined_call_operand.<no memory space> [shape: s32[1], index: 1, kind: input, shape index: {}]   ;;  %s1076_s2 = inlined_call_operand.vmem [shape: f32[1,128], index: 2, kind: input, shape index: {}]   ;;  %s1077_s3 = inlined_call_operand.hbm [shape: f32[120,128], index: 3, kind: input, shape index: {}]   ;;  %s1078_s4 = inlined_call_operand.hbm [shape: f32[1,128], index: 4, kind: output, shape index: {}]  }
   0x1   :  { %11 = vsyncpa [#allocation4], 0 }
   0x2   :  { %12 = vsyncpa [#allocation5], 0  ;;  %s19_s17 = sshll.u32 %s1074_s0, 4  ;;  %s20_s17 = int_to_ptr.vmem [resolvable:$true] %s19_s17 }
   0x3   :  { %s843_s18 = scalar_lea.vmem %s20_s17, 16  ;;  %p848_p1 = scmp.lt.s32.totalorder %s20_s17, %s20_s17 }
   0x4   :  { %p844_p0 = scmp.ne.s32.totalorder %s20_s17, %s843_s18  ;;  %p849_p2 = scmp.lt.s32.totalorder %s843_s18, %s843_s18 }
   0x6   :  { %p850_p3 = por %p849_p2, %p848_p1 }
   0x8   :  { %p851_p4 = pnand %p850_p3, %p844_p0 }
   0xa   :  { %854 = shalt.err (!%p851_p4)
}
   0xb   :  { %s901_s19 = smov [#allocation3]   ;;  %s902_s20 = smov [#allocation7]  }
   0xc   :  { %22 = dma.vmem_to_smem %s20_s17, 16, %s901_s19, [#allocation6]  }
   0xd   :  { %s32_s21 = sshll.u32 %s902_s20, 4  ;;  %s33_s21 = int_to_ptr.vmem [resolvable:$true] %s32_s21 }
   0xe   :  { %s863_s22 = scalar_lea.vmem %s33_s21, 1920  ;;  %p868_p6 = scmp.lt.s32.totalorder %s33_s21, %s33_s21 }
   0xf   :  { %p864_p5 = scmp.ne.s32.totalorder %s33_s21, %s863_s22  ;;  %p869_p7 = scmp.lt.s32.totalorder %s863_s22, %s863_s22 }
  0x11   :  { %p870_p8 = por %p869_p7, %p868_p6 }
  0x13   :  { %p871_p9 = pnand %p870_p8, %p864_p5 }
  0x15   :  { %874 = shalt.err (!%p871_p9)
}
  0x16   :  { %s903_s0 = smov 128   ;;  %s904_s23 = smov 8  }
  0x17   :  { %38 = dma.hbm_to_vmem [thread:$0]  %s1077_s3, 1920, %s33_s21, [#allocation4], %s903_s0, %s903_s0, %s904_s23  }
  0x18   :  { %895 = dma.done.wait [#allocation6], 16  }
  0x19   :  { %896 = vsyncadd [#allocation6], 4294967280 }
  0x1a   :  { %897 = dma.done.wait [#allocation4], 1920  }
  0x1b   :  { %898 = vsyncadd [#allocation4], 4294965376 }
  0x1c   :  { %45 = sfence }
  0x1d   :  { %v63_v0 = vlaneseq  ;;  %v905_v1 = vmov 0.0   ;;  %vm906_vm0 = vmmov 0   ;;  %v949_v3 = vld [vmem:[%s1076_s2] sm:$0x1]  ;;  %v52_v5 = vld [vmem:[#allocation7 + $0x28] sm:$0xff]  ;;  %v50_v7 = vld [vmem:[#allocation7 + $0x18] sm:$0xff] }
  0x1e   :  { %734 = vmatprep.subr.mxu0 %v905_v1  ;;  %740 = vmatprep.mubr.msk.f32.mxu0 %vm906_vm0, %v905_v1  ;;  %v51_v6 = vld [vmem:[#allocation7 + $0x20] sm:$0xff]  ;;  %v54_v10 = vld [vmem:[#allocation7 + $0x38] sm:$0xff]  ;;  %v53_v11 = vld [vmem:[#allocation7 + $0x30] sm:$0xff]  ;;  %vm77_vm1 = vcmask 195584   ;;  %s659_s2 = sld [smem:[#allocation3]]  ;;  %s907_s6 = smov [#allocation8]  }
  0x1f   :  { %v64_v2 = vshrl.u32 %v63_v0, 7  ;;  %749 = vmatprep.subr.mxu1 %v905_v1  ;;  %755 = vmatprep.mubr.msk.f32.mxu1 %vm906_vm0, %v905_v1  ;;  %v55_v8 = vld [vmem:[#allocation7 + $0x40] sm:$0xff]  ;;  %v48_v20 = vld [vmem:[#allocation7 + $0x8] sm:$0xff]  ;;  %v49_v23 = vld [vmem:[#allocation7 + $0x10] sm:$0xff]  ;;  %s696_s27 = sld [smem:[#allocation3 + $0x2]]  ;;  %s685_s7 = sshll.u32 %s907_s6, 4  ;;  %s686_s7 = int_to_ptr.vmem [resolvable:$true] %s685_s7 }
  0x20   :  { %v47_v12 = vld [vmem:[#allocation7] sm:$0xff]  ;;  %v82_v22 = vsel %vm77_vm1, %v48_v20, 0  ;;  %v85_v26 = vsel %vm77_vm1, %v49_v23, 0  ;;  %s695_s28 = sld [smem:[#allocation3 + $0x1]]  ;;  %s875_s8 = scalar_lea.vmem %s686_s7, 16 }
  0x21   :  { %v65_v4 = vsub.s32 0, %v64_v2  ;;  %v79_v19 = vsel %vm77_vm1, %v47_v12, 0  ;;  %v959_v25 = vand.u32 4294901760, %v82_v22  ;;  %v966_v29 = vand.u32 4294901760, %v85_v26  ;;  %v56_v12 = vld [vmem:[#allocation7 + $0x48] sm:$0xff]  ;;  %s697_s29 = sld [smem:[#allocation3 + $0x3]]  ;;  %p876_p10 = scmp.ne.s32.totalorder %s686_s7, %s875_s8 }
  0x22   :  { %v953_v21 = vand.u32 4294901760, %v79_v19  ;;  %s879_s9 = scalar_lea.vmem %s686_s7, 32  ;;  %p880_p11 = scmp.lt.s32.totalorder %s686_s7, %s686_s7 }
  0x23   :  { %v66_v9 = vrot.slane %v949_v3, %v65_v4  ;;  %v964_v28 = vsub.f32 %v82_v22, %v959_v25  ;;  %v973_v33 = vsub.f32 %v85_v26, %v966_v29  ;;  %p881_p12 = scmp.lt.s32.totalorder %s879_s9, %s875_s8 }
  0x24   :  { %v957_v24 = vsub.f32 %v79_v19, %v953_v21 }
  0x25   :  { %v70_v13 = vmul.f32 %v66_v9, %v52_v5  ;;  %v69_v14 = vmul.f32 %v66_v9, %v51_v6  ;;  %v68_v15 = vmul.f32 %v66_v9, %v50_v7  ;;  %v167_v32 = vand.u32 4294901760, %v964_v28  ;;  %p882_p13 = por %p881_p12, %p880_p11 }
  0x26   :  { %v157_v27 = vand.u32 4294901760, %v957_v24  ;;  %v177_v43 = vand.u32 4294901760, %v973_v33 }
  0x27   :  { %v73_v16 = vadd.f32 %v70_v13, %v55_v8  ;;  %v72_v17 = vadd.f32 %v69_v14, %v54_v10  ;;  %v71_v18 = vadd.f32 %v68_v15, %v53_v11  ;;  %v168_v41 = vsub.f32 %v964_v28, %v167_v32  ;;  %v57_v15 = vld [vmem:[#allocation7 + $0x50] sm:$0xff]  ;;  %p883_p0 = pnand %p882_p13, %p876_p10 }
  0x28   :  { %v158_v31 = vsub.f32 %v957_v24, %v157_v27  ;;  %v178_v51 = vsub.f32 %v973_v33, %v177_v43 }
  0x29   :  { %831 = vtanh.f32 %v73_v16  ;;  %v169_v49 = vand.u32 4294901760, %v168_v41 }
  0x2a   :  { %833 = vtanh.f32 %v72_v17  ;;  %v159_v40 = vand.u32 4294901760, %v158_v31  ;;  %v179_v56 = vand.u32 4294901760, %v178_v51 }
  0x2b   :  { %835 = vtanh.f32 %v71_v18 }
  0x36   :  { %v832_v30 = vpop.eup %831 }
  0x37   :  { %v834_v34 = vpop.eup %833  ;;  %v975_v35 = vand.u32 4294901760, %v832_v30 }
  0x38   :  { %v836_v36 = vpop.eup %835  ;;  %v977_v37 = vand.u32 4294901760, %v834_v34 }
  0x39   :  { %735 = vmatpush3.msra.mxu0 %v975_v35  ;;  %v980_v38 = vand.u32 4294901760, %v836_v36  ;;  %v213_v39 = vsub.f32 %v832_v30, %v975_v35 }
  0x3a   :  { %736 = vmatprep.subr.mxu0 %v905_v1  ;;  %v220_v42 = vsub.f32 %v834_v34, %v977_v37 }
  0x3b   :  { %737 = vmatpush3.msra.mxu0 %v977_v37  ;;  %v214_v44 = vand.u32 4294901760, %v213_v39  ;;  %v227_v45 = vsub.f32 %v836_v36, %v980_v38 }
  0x3c   :  { %738 = vmatprep.subr.mxu0 %v905_v1  ;;  %v221_v46 = vand.u32 4294901760, %v220_v42 }
  0x3d   :  { %739 = vmatpush3.msra.mxu0 %v980_v38  ;;  %v215_v47 = vsub.f32 %v213_v39, %v214_v44  ;;  %v228_v48 = vand.u32 4294901760, %v227_v45 }
  0x3e   :  { %741 = vmatmul.mubr.f32.vlgmr.msra.gmra.mxu0 %v159_v40  ;;  %v222_v50 = vsub.f32 %v220_v42, %v221_v46  ;;  %764 = vmatprep.subr.mxu0 %v905_v1 }
  0x3f   :  { %743 = vmatprep.mubr.msk.f32.mxu0 %vm906_vm0, %v905_v1  ;;  %v216_v52 = vand.u32 4294901760, %v215_v47  ;;  %v229_v53 = vsub.f32 %v227_v45, %v228_v48  ;;  %765 = vmatpush3.msra.mxu0 %v213_v39 }
  0x40   :  { %v223_v54 = vand.u32 4294901760, %v222_v50  ;;  %766 = vmatprep.subr.mxu0 %v905_v1 }
  0x41   :  { %750 = vmatpush3.msra.mxu1 %v216_v52  ;;  %v230_v55 = vand.u32 4294901760, %v229_v53  ;;  %767 = vmatpush3.msra.mxu0 %v220_v42  ;;  %v60_v52 = vld [vmem:[#allocation7 + $0x68] sm:$0xff] }
  0x42   :  { %744 = vmatmul.mubr.f32.gmra.mxu0 %v169_v49  ;;  %751 = vmatprep.subr.mxu1 %v905_v1 }
  0x43   :  { %752 = vmatpush3.msra.mxu1 %v223_v54  ;;  %746 = vmatprep.mubr.msk.f32.mxu0 %vm906_vm0, %v905_v1 }
  0x44   :  { %753 = vmatprep.subr.mxu1 %v905_v1  ;;  %768 = vmatprep.subr.mxu0 %v905_v1 }
  0x45   :  { %754 = vmatpush3.msra.mxu1 %v230_v55  ;;  %769 = vmatpush3.msra.mxu0 %v227_v45  ;;  %v59_v55 = vld [vmem:[#allocation7 + $0x60] sm:$0xff] }
  0x46   :  { %747 = vmatmul.mubr.f32.gmra.mxu0 %v179_v56  ;;  %756 = vmatmul.mubr.f32.vlgmr.msra.gmra.mxu1 %v953_v21 }
  0x47   :  { %779 = vmatprep.subr.mxu1 %v905_v1  ;;  %758 = vmatprep.mubr.msk.f32.mxu1 %vm906_vm0, %v905_v1 }
  0x48   :  { %780 = vmatpush3.msra.mxu1 %v975_v35  ;;  %770 = vmatprep.mubr.msk.f32.mxu0 %vm906_vm0, %v905_v1 }
  0x49   :  { %781 = vmatprep.subr.mxu1 %v905_v1  ;;  %794 = vmatprep.subr.mxu0 %v905_v1 }
  0x4a   :  { %759 = vmatmul.mubr.f32.gmra.mxu1 %v959_v25  ;;  %771 = vmatmul.mubr.f32.vlgmr.msra.gmra.mxu0 %v957_v24 }
  0x4b   :  { %782 = vmatpush3.msra.mxu1 %v977_v37  ;;  %761 = vmatprep.mubr.msk.f32.mxu1 %vm906_vm0, %v905_v1 }
  0x4c   :  { %773 = vmatprep.mubr.msk.f32.mxu0 %vm906_vm0, %v905_v1  ;;  %783 = vmatprep.subr.mxu1 %v905_v1 }
  0x4d   :  { %784 = vmatpush3.msra.mxu1 %v980_v38  ;;  %795 = vmatpush3.msra.mxu0 %v214_v44 }
  0x4e   :  { %762 = vmatmul.mubr.f32.gmra.mxu1 %v966_v29  ;;  %774 = vmatmul.mubr.f32.gmra.mxu0 %v964_v28 }
  0x4f   :  { %776 = vmatprep.mubr.msk.f32.mxu0 %vm906_vm0, %v905_v1  ;;  %785 = vmatprep.mubr.msk.f32.mxu1 %vm906_vm0, %v905_v1 }
  0x50   :  { %796 = vmatprep.subr.mxu0 %v905_v1  ;;  %809 = vmatprep.subr.mxu1 %v905_v1 }
  0x51   :  { %797 = vmatpush3.msra.mxu0 %v221_v46 }
  0x52   :  { %777 = vmatmul.mubr.f32.gmra.mxu0 %v973_v33  ;;  %786 = vmatmul.mubr.f32.vlgmr.msra.gmra.mxu1 %v157_v27 }
  0x53   :  { %810 = vmatpush3.msra.mxu1 %v975_v35  ;;  %798 = vmatprep.subr.mxu0 %v905_v1 }
  0x54   :  { %788 = vmatprep.mubr.msk.f32.mxu1 %vm906_vm0, %v905_v1  ;;  %799 = vmatpush3.msra.mxu0 %v228_v48 }
  0x55   :  { %800 = vmatprep.mubr.msk.f32.mxu0 %vm906_vm0, %v905_v1  ;;  %811 = vmatprep.subr.mxu1 %v905_v1 }
  0x56   :  { %789 = vmatmul.mubr.f32.gmra.mxu1 %v167_v32  ;;  %801 = vmatmul.mubr.f32.vlgmr.msra.gmra.mxu0 %v953_v21 }
  0x57   :  { %812 = vmatpush3.msra.mxu1 %v977_v37  ;;  %791 = vmatprep.mubr.msk.f32.mxu1 %vm906_vm0, %v905_v1 }
  0x58   :  { %803 = vmatprep.mubr.msk.f32.mxu0 %vm906_vm0, %v905_v1  ;;  %813 = vmatprep.subr.mxu1 %v905_v1 }
  0x59   :  { %814 = vmatpush3.msra.mxu1 %v980_v38 }
  0x5a   :  { %792 = vmatmul.mubr.f32.gmra.mxu1 %v177_v43  ;;  %804 = vmatmul.mubr.f32.gmra.mxu0 %v959_v25 }
  0x5b   :  { %806 = vmatprep.mubr.msk.f32.mxu0 %vm906_vm0, %v905_v1  ;;  %815 = vmatprep.mubr.msk.f32.mxu1 %vm906_vm0, %v905_v1 }
  0x5e   :  { %807 = vmatmul.mubr.f32.gmra.mxu0 %v966_v29  ;;  %816 = vmatmul.mubr.f32.vlgmr.msra.gmra.mxu1 %v953_v21  ;;  %v58_v21 = vld [vmem:[#allocation7 + $0x58] sm:$0xff] }
  0x5f   :  { %818 = vmatprep.mubr.msk.f32.mxu1 %vm906_vm0, %v905_v1 }
  0x62   :  { %819 = vmatmul.mubr.f32.gmra.mxu1 %v959_v25 }
  0x63   :  { %821 = vmatprep.mubr.msk.f32.mxu1 %vm906_vm0, %v905_v1 }
  0x66   :  { %822 = vmatmul.mubr.f32.gmra.mxu1 %v966_v29 }
  0xfe   :  { %v161_v57 = vpop.f32.mrf.mxu0 }
  0xff   :  { %v162_v14 = vadd.f32 %v161_v57, %v56_v12  ;;  %v61_v57 = vld [vmem:[#allocation7 + $0x70] sm:$0xff] }
 0x100   :  { %v742_v58 = vpop.f32.mrf.mxu0 }
 0x102   :  { %v171_v59 = vpop.f32.mrf.mxu0 }
 0x103   :  { %v172_v20 = vadd.f32 %v171_v59, %v57_v15  ;;  %v672_v15 = vstv %s697_s29 }
 0x104   :  { %v745_v60 = vpop.f32.mrf.mxu0 }
 0x106   :  { %v181_v61 = vpop.f32.mrf.mxu0  ;;  %v267_v62 = vpop.f32.mrf.mxu1 }
 0x107   :  { %v268_v22 = vadd.f32 %v267_v62, %v162_v14  ;;  %v182_v28 = vadd.f32 %v181_v61, %v58_v21  ;;  %v675_v14 = vstv %s1075_s1 }
 0x108   :  { %v748_v63 = vpop.f32.mrf.mxu0  ;;  %v757_v2 = vpop.f32.mrf.mxu1 }
 0x10a   :  { %v273_v4 = vpop.f32.mrf.mxu1  ;;  %v357_v5 = vpop.f32.mrf.mxu0 }
 0x10b   :  { %v358_v25 = vadd.f32 %v357_v5, %v268_v22  ;;  %v274_v29 = vadd.f32 %v273_v4, %v172_v20 }
 0x10c   :  { %v760_v6 = vpop.f32.mrf.mxu1  ;;  %v772_v7 = vpop.f32.mrf.mxu0 }
 0x10d   :  { %v660_v7 = vstv %s659_s2 }
 0x10e   :  { %v279_v8 = vpop.f32.mrf.mxu1  ;;  %v364_v9 = vpop.f32.mrf.mxu0 }
 0x10f   :  { %v365_v33 = vadd.f32 %v364_v9, %v274_v29  ;;  %v280_v37 = vadd.f32 %v279_v8, %v182_v28  ;;  %v668_v8 = vstv %s696_s27 }
 0x110   :  { %v763_v10 = vpop.f32.mrf.mxu1  ;;  %v775_v11 = vpop.f32.mrf.mxu0  ;;  %v669_v12 = vmul.f32 %v668_v8, %v949_v3 }
 0x111   :  { %v665_v10 = vstv %s695_s28 }
 0x112   :  { %v371_v1 = vpop.f32.mrf.mxu0  ;;  %v447_v13 = vpop.f32.mrf.mxu1 }
 0x113   :  { %v448_v30 = vadd.f32 %v447_v13, %v358_v25  ;;  %v372_v42 = vadd.f32 %v371_v1, %v280_v37  ;;  %v663_v1 = vand.u32 127, %v63_v0 }
 0x114   :  { %v778_v16 = vpop.f32.mrf.mxu0  ;;  %v787_v17 = vpop.f32.mrf.mxu1 }
 0x115   :  { %vm676_vm2 = vcmp.lt.s32.totalorder %v663_v1, %v675_v14 }
 0x116   :  { %v455_v18 = vpop.f32.mrf.mxu1  ;;  %v543_v19 = vpop.f32.mrf.mxu0 }
 0x117   :  { %v544_v34 = vadd.f32 %v543_v19, %v448_v30  ;;  %v456_v38 = vadd.f32 %v455_v18, %v365_v33 }
 0x118   :  { %v790_v23 = vpop.f32.mrf.mxu1  ;;  %v802_v24 = vpop.f32.mrf.mxu0 }
 0x11a   :  { %v463_v26 = vpop.f32.mrf.mxu1  ;;  %v549_v27 = vpop.f32.mrf.mxu0 }
 0x11b   :  { %v550_v43 = vadd.f32 %v549_v27, %v456_v38  ;;  %v464_v45 = vadd.f32 %v463_v26, %v372_v42 }
 0x11c   :  { %v793_v31 = vpop.f32.mrf.mxu1  ;;  %v805_v32 = vpop.f32.mrf.mxu0 }
 0x11e   :  { %v555_v35 = vpop.f32.mrf.mxu0  ;;  %v629_v36 = vpop.f32.mrf.mxu1 }
 0x11f   :  { %v630_v39 = vadd.f32 %v629_v36, %v544_v34  ;;  %v556_v48 = vadd.f32 %v555_v35, %v464_v45 }
 0x120   :  { %v817_v40 = vpop.f32.mrf.mxu1  ;;  %v808_v41 = vpop.f32.mrf.mxu0 }
 0x121   :  { %837 = vtanh.f32 %v630_v39 }
 0x122   :  { %v635_v44 = vpop.f32.mrf.mxu1 }
 0x123   :  { %v636_v46 = vadd.f32 %v635_v44, %v550_v43 }
 0x124   :  { %v820_v47 = vpop.f32.mrf.mxu1 }
 0x125   :  { %839 = vtanh.f32 %v636_v46 }
 0x126   :  { %v641_v49 = vpop.f32.mrf.mxu1 }
 0x127   :  { %v642_v50 = vadd.f32 %v641_v49, %v556_v48 }
 0x128   :  { %v823_v51 = vpop.f32.mrf.mxu1 }
 0x129   :  { %841 = vtanh.f32 %v642_v50 }
 0x12e   :  { %v838_v53 = vpop.eup %837 }
 0x12f   :  { %v648_v58 = vmul.f32 %v838_v53, %v59_v55 }
 0x132   :  { %v840_v54 = vpop.eup %839 }
 0x133   :  { %v649_v56 = vmul.f32 %v840_v54, %v60_v52 }
 0x135   :  { %v651_v61 = vadd.f32 %v649_v56, %v648_v58 }
 0x136   :  { %v842_v59 = vpop.eup %841 }
 0x137   :  { %v650_v60 = vmul.f32 %v842_v59, %v61_v57 }
 0x139   :  { %v652_v62 = vadd.f32 %v651_v61, %v650_v60 }
 0x13b   :  { %v653_v63 = vrot.slane %v652_v62, 4 }
 0x13d   :  { %v654_v2 = vadd.f32 %v653_v63, %v652_v62 }
 0x13f   :  { %v655_v4 = vrot.slane %v654_v2, 2 }
 0x141   :  { %v656_v5 = vadd.f32 %v655_v4, %v654_v2 }
 0x143   :  { %v657_v6 = vrot.slane %v656_v5, 1 }
 0x145   :  { %v658_v9 = vadd.f32 %v657_v6, %v656_v5 }
 0x147   :  { %v661_v11 = vadd.f32 %v660_v7, %v658_v9 }
 0x149   :  { %v666_v13 = vmul.f32 %v665_v10, %v661_v11 }
 0x14b   :  { %v670_v16 = vadd.f32 %v669_v12, %v666_v13 }
 0x14d   :  { %v673_v17 = vadd.f32 %v672_v15, %v670_v16 }
 0x14f   :  { %v677_v18 = vsel %vm676_vm2, %v661_v11, %v673_v17 }
 0x150   :  { %678 = vst [vmem:[#allocation8] sm:$0x1] %v677_v18 }
 0x151   :  { %886 = shalt.err (!%p883_p0)
}
 0x152   :  { %688 = dma.vmem_to_hbm [thread:$0]  %s686_s7, 16, %s1078_s4, [#allocation5]  }
 0x153   :  { %899 = dma.done.wait [#allocation5], 16  }
 0x154   :  { %900 = vsyncadd [#allocation5], 4294967280 }
 0x155   :  { %692 = vsyncpa [#allocation4], 1 }
 0x156   :  { %693 = vsyncpa [#allocation5], 1 }
 0x157   :  { %694 = vsyncpa [#allocation6], 1 }

</bundles_post_ra>
